<compile_context>
chip_gen: v7x
topology: tpu7x:2x2x1
jax: 0.10.0
libtpu: 0.0.40
codegen_flags: <defaults>
</compile_context>

<pallas_src>
import functools

import jax
import jax.numpy as jnp
from jax import lax
from jax.experimental import pallas as pl
from jax.experimental.pallas import tpu as pltpu


def _round_up(x, m):
    return ((x + m - 1) // m) * m


# ---------------------------------------------------------------------------
# Stage 1:  t = adj.T @ embs   (contract over the node axis N)
# ---------------------------------------------------------------------------
def _adjT_embs_kernel(adj_ref, embs_ref, t_ref, acc_ref):
    k = pl.program_id(2)

    @pl.when(k == 0)
    def _():
        acc_ref[...] = jnp.zeros_like(acc_ref)

    # (tn, te).T @ (tn, td) -> (te, td): contracting dim 0 of both operands
    # lowers to a transposed-LHS MXU matmul (no per-tile transpose copy).
    acc_ref[...] += lax.dot_general(
        adj_ref[...], embs_ref[...],
        dimension_numbers=(((0,), (0,)), ((), ())),
        preferred_element_type=jnp.float32,
    )

    @pl.when(k == pl.num_programs(2) - 1)
    def _():
        t_ref[...] = acc_ref[...].astype(t_ref.dtype)


# ---------------------------------------------------------------------------
# Stage 2:  out = act(adj @ t)   (contract over the hyperedge axis E)
# ---------------------------------------------------------------------------
def _adj_t_kernel(adj_ref, t_ref, out_ref, acc_ref, *, leaky, act):
    k = pl.program_id(2)

    @pl.when(k == 0)
    def _():
        acc_ref[...] = jnp.zeros_like(acc_ref)

    acc_ref[...] += jnp.dot(
        adj_ref[...], t_ref[...], preferred_element_type=jnp.float32
    )

    @pl.when(k == pl.num_programs(2) - 1)
    def _():
        y = acc_ref[...]
        if act:
            # LeakyReLU(negative_slope=leaky), same semantics as torch.nn.LeakyReLU
            y = jnp.where(y >= 0, y, leaky * y)
        out_ref[...] = y.astype(out_ref.dtype)


def hgcn_conv(adj, embs, leaky=0.2, act=True):
    """Pallas TPU implementation of HGCNConv.forward(adj, embs, act)."""
    N, E = adj.shape
    N2, D = embs.shape
    assert N == N2, "adj and embs must share the node dimension"
    out_dtype = embs.dtype

    # Feed both MXU operands in the embedding dtype: bf16 embs engages the ~2x
    # bf16 MXU path; adj values are 0/1 so the cast is exact.
    adj = adj.astype(embs.dtype)
    t_dtype = embs.dtype  # intermediate stored in input precision (f32 stays f32)

    # ---- tile / padding choices -------------------------------------------
    tm = min(_round_up(N, 8), 256)     # stage-2 output row tile (sublane dim)
    tn = tm                            # stage-1 reduction tile over N
    te = min(_round_up(E, 128), 256)   # hyperedge tile (lane dim of adj)
    Dp128 = _round_up(D, 128)
    td = Dp128 if Dp128 <= 1024 else 512   # feature tile (lane dim of embs/t/out)
    Np = _round_up(N, tm)
    Ep = _round_up(E, te)
    Dp = _round_up(D, td)
    # <=256x1024 f32 tiles (double-buffered) stay far under 32 MiB scoped VMEM
    # on all of v5e/v6e/v7x; set the limit explicitly (raises v5e's 16 MiB
    # default, stays within v7x's 64 MiB physical).
    vmem_limit = 32 * 1024 * 1024

    adj_p = jnp.pad(adj, ((0, Np - N), (0, Ep - E)))
    embs_p = jnp.pad(embs, ((0, Np - N), (0, Dp - D)))

    # ---- stage 1: t = adj.T @ embs (computed once, HBM-resident) -----------
    t = pl.pallas_call(
        _adjT_embs_kernel,
        out_shape=jax.ShapeDtypeStruct((Ep, Dp), t_dtype),
        grid_spec=pltpu.PrefetchScalarGridSpec(
            num_scalar_prefetch=0,
            grid=(Ep // te, Dp // td, Np // tn),     # (E tiles, D tiles, N reduction)
            in_specs=[
                pl.BlockSpec((tn, te), lambda i, j, k: (k, i)),   # adj
                pl.BlockSpec((tn, td), lambda i, j, k: (k, j)),   # embs
            ],
            out_specs=pl.BlockSpec((te, td), lambda i, j, k: (i, j)),
            scratch_shapes=[pltpu.VMEM((te, td), jnp.float32)],
        ),
        compiler_params=pltpu.CompilerParams(
            dimension_semantics=("parallel", "parallel", "arbitrary"),
            vmem_limit_bytes=vmem_limit,
        ),
    )(adj_p, embs_p)

    # ---- stage 2: out = act(adj @ t) ---------------------------------------
    kernel2 = functools.partial(_adj_t_kernel, leaky=leaky, act=act)
    out_p = pl.pallas_call(
        kernel2,
        out_shape=jax.ShapeDtypeStruct((Np, Dp), out_dtype),
        grid_spec=pltpu.PrefetchScalarGridSpec(
            num_scalar_prefetch=0,
            grid=(Np // tm, Dp // td, Ep // te),     # (row tiles, D tiles, E reduction)
            in_specs=[
                pl.BlockSpec((tm, te), lambda i, j, k: (i, k)),   # adj
                pl.BlockSpec((te, td), lambda i, j, k: (k, j)),   # t
            ],
            out_specs=pl.BlockSpec((tm, td), lambda i, j, k: (i, j)),
            scratch_shapes=[pltpu.VMEM((tm, td), jnp.float32)],
        ),
        compiler_params=pltpu.CompilerParams(
            dimension_semantics=("parallel", "parallel", "arbitrary"),
            vmem_limit_bytes=vmem_limit,
        ),
    )(adj_p, t)

    return out_p[:N, :D]


if __name__ == "__main__":
    key = jax.random.PRNGKey(0)
    k_adj, k_emb, k_adj2, k_emb2 = jax.random.split(key, 4)

    leaky = 0.2

    def ref_fn(adj, embs, act=True):
        y = adj @ (adj.T @ embs)
        return jnp.where(y >= 0, y, leaky * y) if act else y

    # Small shapes consistent with the module: N nodes, E hyperedges, D dims.
    N, E, D = 16, 8, 32
    adj = jax.random.bernoulli(k_adj, p=0.3, shape=(N, E)).astype(jnp.float32)
    embs = jax.random.normal(k_emb, (N, D), dtype=jnp.float32)

    out = jax.block_until_ready(hgcn_conv(adj, embs, leaky=leaky, act=True))
    assert out.shape == (N, D) and out.dtype == embs.dtype
    assert jnp.allclose(out, ref_fn(adj, embs, True), atol=1e-5, rtol=1e-5)

    out_noact = jax.block_until_ready(hgcn_conv(adj, embs, leaky=leaky, act=False))
    assert jnp.allclose(out_noact, ref_fn(adj, embs, False), atol=1e-5, rtol=1e-5)

    # A second shape that exercises multi-step reduction and multiple row tiles.
    N2_, E2_, D2_ = 300, 200, 96
    adj2 = jax.random.bernoulli(k_adj2, p=0.1, shape=(N2_, E2_)).astype(jnp.float32)
    embs2 = jax.random.normal(k_emb2, (N2_, D2_), dtype=jnp.float32)
    out2 = jax.block_until_ready(hgcn_conv(adj2, embs2, leaky=leaky, act=True))
    assert out2.shape == (N2_, D2_)
    assert jnp.allclose(out2, ref_fn(adj2, embs2, True), atol=1e-3, rtol=1e-3)

    print("KERNEL_OK")
</pallas_src>

<mosaic_0001>
module attributes {stable_mosaic.version = 11 : i64} {
  func.func @_adjT_embs_kernel(%arg0: i32, %arg1: i32, %arg2: i32, %arg3: memref<16x128xf32, #tpu.memory_space<vmem>>, %arg4: memref<16x128xf32, #tpu.memory_space<vmem>>, %arg5: memref<128x128xf32, #tpu.memory_space<vmem>>, %arg6: memref<128x128xf32, #tpu.memory_space<vmem>>) attributes {dimension_semantics = [#tpu.dimension_semantics<parallel>, #tpu.dimension_semantics<parallel>, #tpu.dimension_semantics<arbitrary>], iteration_bounds = array<i64: 1, 1, 1>, scalar_prefetch = 0 : i64, scratch_operands = 1 : i64, tpu.core_type = #tpu.core_type<tc>, window_params = [{transform_indices = @transform_0, window_bounds = array<i64: 16, 128>}, {transform_indices = @transform_1, window_bounds = array<i64: 16, 128>}, {transform_indices = @transform_2, window_bounds = array<i64: 128, 128>}]} {
    %c0_i32 = arith.constant 0 : i32
    %0 = arith.cmpi eq, %arg2, %c0_i32 : i32
    %1 = arith.extui %0 : i1 to i32
    %c0_i32_0 = arith.constant 0 : i32
    %2 = arith.cmpi ne, %1, %c0_i32_0 : i32
    scf.if %2 {
      %cst_10 = arith.constant 0.000000e+00 : f32
      %12 = vector.broadcast %cst_10 : f32 to vector<128x128xf32>
      %c0_11 = arith.constant 0 : index
      %c0_12 = arith.constant 0 : index
      %13 = vector.load %arg6[%c0_11, %c0_12] : memref<128x128xf32, #tpu.memory_space<vmem>>, vector<128x128xf32>
      tpu.vector_store %arg6[%c0_11, %c0_12], %12 {strides = array<i32>} : memref<128x128xf32, #tpu.memory_space<vmem>>, vector<128x128xf32>,
    } else {
    }
    %c0 = arith.constant 0 : index
    %c0_1 = arith.constant 0 : index
    %3 = vector.load %arg6[%c0, %c0_1] : memref<128x128xf32, #tpu.memory_space<vmem>>, vector<128x128xf32>
    %c0_2 = arith.constant 0 : index
    %c0_3 = arith.constant 0 : index
    %4 = vector.load %arg3[%c0_2, %c0_3] : memref<16x128xf32, #tpu.memory_space<vmem>>, vector<16x128xf32>
    %c0_4 = arith.constant 0 : index
    %c0_5 = arith.constant 0 : index
    %5 = vector.load %arg4[%c0_4, %c0_5] : memref<16x128xf32, #tpu.memory_space<vmem>>, vector<16x128xf32>
    %cst = arith.constant dense<0.000000e+00> : vector<128x128xf32>
    %6 = tpu.matmul %4, %5, %cst {dimension_numbers = #tpu.dot_dimension_numbers<[0], [0], [1], [1], [0, 1, 1, 1], [], []>} : vector<16x128xf32>, vector<16x128xf32>, vector<128x128xf32> -> vector<128x128xf32>
    %7 = arith.addf %3, %6 : vector<128x128xf32>
    %c0_6 = arith.constant 0 : index
    %c0_7 = arith.constant 0 : index
    %8 = vector.load %arg6[%c0_6, %c0_7] : memref<128x128xf32, #tpu.memory_space<vmem>>, vector<128x128xf32>
    tpu.vector_store %arg6[%c0_6, %c0_7], %7 {strides = array<i32>} : memref<128x128xf32, #tpu.memory_space<vmem>>, vector<128x128xf32>,
    %c0_i32_8 = arith.constant 0 : i32
    %9 = arith.cmpi eq, %arg2, %c0_i32_8 : i32
    %10 = arith.extui %9 : i1 to i32
    %c0_i32_9 = arith.constant 0 : i32
    %11 = arith.cmpi ne, %10, %c0_i32_9 : i32
    scf.if %11 {
      %c0_10 = arith.constant 0 : index
      %c0_11 = arith.constant 0 : index
      %12 = vector.load %arg6[%c0_10, %c0_11] : memref<128x128xf32, #tpu.memory_space<vmem>>, vector<128x128xf32>
      %c0_12 = arith.constant 0 : index
      %c0_13 = arith.constant 0 : index
      %13 = vector.load %arg5[%c0_12, %c0_13] : memref<128x128xf32, #tpu.memory_space<vmem>>, vector<128x128xf32>
      tpu.vector_store %arg5[%c0_12, %c0_13], %12 {strides = array<i32>} : memref<128x128xf32, #tpu.memory_space<vmem>>, vector<128x128xf32>,
    } else {
    }
    return
  }
  func.func @transform_0(%arg0: i32, %arg1: i32, %arg2: i32) -> (i32, i32) {
    %c0_i32 = arith.constant 0 : i32
    return %arg2, %arg0 : i32, i32
  }
  func.func @transform_1(%arg0: i32, %arg1: i32, %arg2: i32) -> (i32, i32) {
    %c0_i32 = arith.constant 0 : i32
    return %arg2, %arg1 : i32, i32
  }
  func.func @transform_2(%arg0: i32, %arg1: i32, %arg2: i32) -> (i32, i32) {
    %c0_i32 = arith.constant 0 : i32
    return %arg0, %arg1 : i32, i32
  }
}

</mosaic_0001>

<bundles_post_ra>
// kernel: tpu_custom_call.1
= control target key start
LH: loop header
LB: loop body
LE: loop exit
PB: predicated region body
PF: predicated region fallthrough
CT: control target
= control target key end

     0   :  { %7 = vsyncpa [#allocation4], 0  ;;  %s618_s0 = inlined_call_operand.hbm [shape: f32[16,128], index: 0, kind: input, shape index: {}]   ;;  %s619_s1 = inlined_call_operand.hbm [shape: f32[16,128], index: 1, kind: input, shape index: {}]   ;;  %s620_s2 = inlined_call_operand.hbm [shape: f32[128,128], index: 2, kind: output, shape index: {}]  }
   0x1   :  { %8 = vsyncpa [#allocation7], 0 }
   0x2   :  { %9 = vsyncpa [#allocation5], 0  ;;  %s537_s9 = smov [#allocation3]   ;;  %s465_s13 = scalar_lea.hbm %s618_s0, 256 }
   0x3   :  { %s15_s10 = sshll.u32 %s537_s9, 4  ;;  %p466_p0 = scmp.ne.s32.totalorder %s618_s0, %s465_s13  ;;  %s16_s10 = int_to_ptr.vmem [resolvable:$true] %s15_s10 }
   0x4   :  { %p469_p1 = scmp.lt.u32.totalorder %s465_s13, %s618_s0 }
   0x6   :  { %p471_p2 = pnand %p469_p1, %p466_p0 }
   0x8   :  { %474 = shalt.err (!%p471_p2)
}
   0x9   :  { %s475_s18 = scalar_lea.vmem %s16_s10, 256  ;;  %p480_p4 = scmp.lt.s32.totalorder %s16_s10, %s16_s10 }
   0xa   :  { %p476_p3 = scmp.ne.s32.totalorder %s16_s10, %s475_s18  ;;  %p481_p5 = scmp.lt.s32.totalorder %s475_s18, %s475_s18 }
   0xc   :  { %p482_p6 = por %p481_p5, %p480_p4 }
   0xe   :  { %p483_p7 = pnand %p482_p6, %p476_p3 }
  0x10   :  { %486 = shalt.err (!%p483_p7)
}
  0x11   :  { %s538_s19 = smov 128   ;;  %s539_s20 = smov 8  }
  0x12   :  { %21 = dma.hbm_to_vmem [thread:$0]  %s618_s0, 256, %s16_s10, [#allocation4], %s538_s19, %s538_s19, %s539_s20  }
  0x13   :  { %s540_s23 = smov [#allocation6]   ;;  %s487_s27 = scalar_lea.hbm %s619_s1, 256 }
  0x14   :  { %s27_s24 = sshll.u32 %s540_s23, 4  ;;  %p488_p8 = scmp.ne.s32.totalorder %s619_s1, %s487_s27  ;;  %s28_s24 = int_to_ptr.vmem [resolvable:$true] %s27_s24 }
  0x15   :  { %p491_p9 = scmp.lt.u32.totalorder %s487_s27, %s619_s1 }
  0x17   :  { %p493_p10 = pnand %p491_p9, %p488_p8 }
  0x19   :  { %496 = shalt.err (!%p493_p10)
}
  0x1a   :  { %s497_s4 = scalar_lea.vmem %s28_s24, 256  ;;  %p502_p12 = scmp.lt.s32.totalorder %s28_s24, %s28_s24 }
  0x1b   :  { %p498_p11 = scmp.ne.s32.totalorder %s28_s24, %s497_s4  ;;  %p503_p13 = scmp.lt.s32.totalorder %s497_s4, %s497_s4 }
  0x1d   :  { %p504_p0 = por %p503_p13, %p502_p12 }
  0x1f   :  { %p505_p1 = pnand %p504_p0, %p498_p11 }
  0x21   :  { %508 = shalt.err (!%p505_p1)
}
  0x22   :  { %33 = dma.hbm_to_vmem [thread:$0]  %s619_s1, 256, %s28_s24, [#allocation7], %s538_s19, %s538_s19, %s539_s20  }
  0x23   :  { %531 = dma.done.wait [#allocation4], 256  }
  0x24   :  { %532 = vsyncadd [#allocation4], 4294967040 }
  0x25   :  { %533 = dma.done.wait [#allocation7], 256  }
  0x26   :  { %534 = vsyncadd [#allocation7], 4294967040  ;;  %v76_v0 = vld [vmem:[#allocation3] sm:$0xff]  ;;  %v78_v1 = vld [vmem:[#allocation6] sm:$0xff]  ;;  %vm112_vm0 = vcmask 130048   ;;  %s541_s1 = smov [#allocation8]  }
  0x27   :  { %80 = vxpose.xlu0.b32.start [1/2] (short) %v76_v0, 128  ;;  %v79_v2 = vld [vmem:[#allocation6 + $0x8] sm:$0xff]  ;;  %v77_v3 = vld [vmem:[#allocation3 + $0x8] sm:$0xff]  ;;  %s378_s6 = sshll.u32 %s541_s1, 4  ;;  %s379_s6 = int_to_ptr.vmem [resolvable:$true] %s378_s6 }
  0x28   :  { %v453_v4 = vpack.c.bf16 %v79_v2, %v78_v1  ;;  %s509_s7 = scalar_lea.vmem %s379_s6, 2048  ;;  %p514_p3 = scmp.lt.s32.totalorder %s379_s6, %s379_s6 }
  0x29   :  { %p510_p2 = scmp.ne.s32.totalorder %s379_s6, %s509_s7  ;;  %p515_p4 = scmp.lt.s32.totalorder %s509_s7, %s509_s7 }
  0x2a   :  { %454 = vmatprep.subr.bf16.mxu0 %v453_v4  ;;  %457 = vmatprep.subr.bf16.mxu1 %v453_v4 }
  0x2b   :  { %81 = vxpose.xlu0.b32.end [2/2] (short) %v77_v3, 128  ;;  %456 = vmatpush3.bf16.msra.mxu0 %v453_v4  ;;  %p516_p5 = por %p515_p4, %p514_p3 }
  0x2c   :  { %458 = vmatpush3.bf16.msra.mxu1 %v453_v4 }
  0x2d   :  { %p517_p6 = pnand %p516_p5, %p510_p2 }
  0xa7   :  { %v96_v5 = vpop.trf.xlu0 }
  0xa8   :  { %429 = vmatprep.mubr.msk.f32.mxu0 %vm112_vm0, %v96_v5 }
  0xab   :  { %v97_v6 = vpop.trf.xlu0 }
  0xac   :  { %430 = vmatmul.mubr.msk.f32.vlgmr.msra.gmra.mrb[0].mxu0 %vm112_vm0, %v97_v6 }
  0xaf   :  { %v98_v7 = vpop.trf.xlu0 }
  0xb0   :  { %432 = vmatprep.mubr.msk.f32.mxu0 %vm112_vm0, %v98_v7 }
  0xb3   :  { %v99_v8 = vpop.trf.xlu0 }
  0xb4   :  { %433 = vmatmul.mubr.msk.f32.gmra.mrb[2].mxu0 %vm112_vm0, %v99_v8 }
  0xb7   :  { %v100_v9 = vpop.trf.xlu0 }
  0xb8   :  { %435 = vmatprep.mubr.msk.f32.mxu0 %vm112_vm0, %v100_v9 }
  0xbb   :  { %v101_v10 = vpop.trf.xlu0 }
  0xbc   :  { %436 = vmatmul.mubr.msk.f32.gmra.mrb[4].mxu0 %vm112_vm0, %v101_v10 }
  0xbf   :  { %v102_v11 = vpop.trf.xlu0 }
  0xc0   :  { %438 = vmatprep.mubr.msk.f32.mxu0 %vm112_vm0, %v102_v11 }
  0xc3   :  { %v103_v12 = vpop.trf.xlu0 }
  0xc4   :  { %439 = vmatmul.mubr.msk.f32.gmra.mrb[6].mxu0 %vm112_vm0, %v103_v12 }
  0xc7   :  { %v104_v13 = vpop.trf.xlu0 }
  0xc8   :  { %441 = vmatprep.mubr.msk.f32.mxu1 %vm112_vm0, %v104_v13 }
  0xcb   :  { %v105_v14 = vpop.trf.xlu0 }
  0xcc   :  { %442 = vmatmul.mubr.msk.f32.vlgmr.msra.gmra.mrb[0].mxu1 %vm112_vm0, %v105_v14 }
  0xcf   :  { %v106_v15 = vpop.trf.xlu0 }
  0xd0   :  { %444 = vmatprep.mubr.msk.f32.mxu1 %vm112_vm0, %v106_v15 }
  0xd3   :  { %v107_v16 = vpop.trf.xlu0 }
  0xd4   :  { %445 = vmatmul.mubr.msk.f32.gmra.mrb[2].mxu1 %vm112_vm0, %v107_v16 }
  0xd7   :  { %v108_v17 = vpop.trf.xlu0 }
  0xd8   :  { %447 = vmatprep.mubr.msk.f32.mxu1 %vm112_vm0, %v108_v17 }
  0xdb   :  { %v109_v18 = vpop.trf.xlu0 }
  0xdc   :  { %448 = vmatmul.mubr.msk.f32.gmra.mrb[4].mxu1 %vm112_vm0, %v109_v18 }
  0xdf   :  { %v110_v19 = vpop.trf.xlu0 }
  0xe0   :  { %450 = vmatprep.mubr.msk.f32.mxu1 %vm112_vm0, %v110_v19 }
  0xe3   :  { %v111_v20 = vpop.trf.xlu0 }
  0xe4   :  { %451 = vmatmul.mubr.msk.f32.gmra.mrb[6].mxu1 %vm112_vm0, %v111_v20 }
 0x17f   :  { %v431_v21 = vpop.f32.mrb[0].mxu0 }
 0x180   :  { %358 = vst [vmem:[#allocation8 + $0x8] sm:$0xff] %v431_v21  ;;  %v227_v22 = vpop.f32.mrb[1].mxu0 }
 0x181   :  { %357 = vst [vmem:[#allocation8] sm:$0xff] %v227_v22 }
 0x187   :  { %v434_v23 = vpop.f32.mrb[2].mxu0 }
 0x188   :  { %360 = vst [vmem:[#allocation8 + $0x18] sm:$0xff] %v434_v23  ;;  %v237_v24 = vpop.f32.mrb[3].mxu0 }
 0x189   :  { %359 = vst [vmem:[#allocation8 + $0x10] sm:$0xff] %v237_v24 }
 0x18f   :  { %v437_v25 = vpop.f32.mrb[4].mxu0 }
 0x190   :  { %362 = vst [vmem:[#allocation8 + $0x28] sm:$0xff] %v437_v25  ;;  %v247_v26 = vpop.f32.mrb[5].mxu0 }
 0x191   :  { %361 = vst [vmem:[#allocation8 + $0x20] sm:$0xff] %v247_v26 }
 0x197   :  { %v440_v27 = vpop.f32.mrb[6].mxu0 }
 0x198   :  { %364 = vst [vmem:[#allocation8 + $0x38] sm:$0xff] %v440_v27  ;;  %v257_v28 = vpop.f32.mrb[7].mxu0 }
 0x199   :  { %363 = vst [vmem:[#allocation8 + $0x30] sm:$0xff] %v257_v28 }
 0x19f   :  { %v443_v29 = vpop.f32.mrb[0].mxu1 }
 0x1a0   :  { %366 = vst [vmem:[#allocation8 + $0x48] sm:$0xff] %v443_v29  ;;  %v267_v30 = vpop.f32.mrb[1].mxu1 }
 0x1a1   :  { %365 = vst [vmem:[#allocation8 + $0x40] sm:$0xff] %v267_v30 }
 0x1a7   :  { %v446_v31 = vpop.f32.mrb[2].mxu1 }
 0x1a8   :  { %368 = vst [vmem:[#allocation8 + $0x58] sm:$0xff] %v446_v31  ;;  %v277_v32 = vpop.f32.mrb[3].mxu1 }
 0x1a9   :  { %367 = vst [vmem:[#allocation8 + $0x50] sm:$0xff] %v277_v32 }
 0x1af   :  { %v449_v33 = vpop.f32.mrb[4].mxu1 }
 0x1b0   :  { %370 = vst [vmem:[#allocation8 + $0x68] sm:$0xff] %v449_v33  ;;  %v287_v34 = vpop.f32.mrb[5].mxu1 }
 0x1b1   :  { %369 = vst [vmem:[#allocation8 + $0x60] sm:$0xff] %v287_v34 }
 0x1b7   :  { %v452_v35 = vpop.f32.mrb[6].mxu1 }
 0x1b8   :  { %372 = vst [vmem:[#allocation8 + $0x78] sm:$0xff] %v452_v35  ;;  %v297_v36 = vpop.f32.mrb[7].mxu1 }
 0x1b9   :  { %371 = vst [vmem:[#allocation8 + $0x70] sm:$0xff] %v297_v36 }
 0x1ba   :  { %520 = shalt.err (!%p517_p6)
}
 0x1bb   :  { %s521_s10 = scalar_lea.hbm %s620_s2, 2048 }
 0x1bc   :  { %p522_p7 = scmp.ne.s32.totalorder %s620_s2, %s521_s10  ;;  %p525_p8 = scmp.lt.u32.totalorder %s521_s10, %s620_s2 }
 0x1be   :  { %p527_p9 = pnand %p525_p8, %p522_p7 }
 0x1c0   :  { %530 = shalt.err (!%p527_p9)
}
 0x1c1   :  { %384 = dma.vmem_to_hbm [thread:$0]  %s379_s6, 2048, %s620_s2, [#allocation5], %s538_s19, %s538_s19, %s539_s20  }
 0x1c2   :  { %535 = dma.done.wait [#allocation5], 2048  }
 0x1c3   :  { %536 = vsyncadd [#allocation5], 4294965248 }
 0x1c4   :  { %388 = vsyncpa [#allocation4], 1 }
 0x1c5   :  { %389 = vsyncpa [#allocation7], 1 }
 0x1c6   :  { %390 = vsyncpa [#allocation5], 1 }

</bundles_post_ra>
